<compile_context>
chip_gen: v5e
topology: v5e:2x2
jax: 0.10.0
libtpu: 0.0.40
codegen_flags: <defaults>
</compile_context>

<pallas_src>
import functools

import jax
import jax.numpy as jnp
from jax.experimental import pallas as pl
from jax.experimental.pallas import tpu as pltpu


def _round_up(n, m):
    return ((n + m - 1) // m) * m


def _fc_classifier_kernel(
    x_ref,
    w1, b1, w2, b2, w3, b3, w4, b4, w5, b5,   # 5 x (Linear + ReLU)
    wt, bt,                                   # fused tail: [encoded | fused logit | 0-pad]
    out_ref,
    *, n_hidden2, n_out,
):
    """Whole MLP hot path for one batch tile; writes a single lane-dense slab."""
    h = x_ref[...].astype(jnp.float32)

    # 5 hidden Linear+ReLU layers: bf16 MXU inputs, f32 accumulation, f32 epilogue.
    for w_ref, b_ref in ((w1, b1), (w2, b2), (w3, b3), (w4, b4), (w5, b5)):
        h = jnp.dot(h.astype(w_ref.dtype), w_ref[...],
                    preferred_element_type=jnp.float32) + b_ref[...]
        h = jnp.maximum(h, 0.0)

    # Fused tail: one N=128 matmul produces encoded (cols [0, n_hidden2)) and the
    # pre-fused logit columns (cols [n_hidden2, n_hidden2+n_out)) in one slab.
    tail = jnp.dot(h.astype(wt.dtype), wt[...],
                   preferred_element_type=jnp.float32) + bt[...]

    # Sigmoid only on the logit columns (EUP exp + approx reciprocal; VPU select).
    col = jax.lax.broadcasted_iota(jnp.int32, tail.shape, dimension=1)
    is_logit = (col >= n_hidden2) & (col < n_hidden2 + n_out)
    sig = pl.reciprocal(1.0 + jnp.exp(-tail), approx=True)
    out_ref[...] = jnp.where(is_logit, sig, tail)


def init_params(key, nz, n_hidden1=1024, n_hidden2=2, n_out=1, dtype=jnp.float32):
    """Deterministic synthetic parameters (weights stored as (in, out), bias (1, out))."""
    dims = [(nz, n_hidden1)] + [(n_hidden1, n_hidden1)] * 4 + \
           [(n_hidden1, n_hidden2), (n_hidden2, n_out)]
    params = []
    for (fan_in, fan_out) in dims:
        key, kw, kb = jax.random.split(key, 3)
        scale = 1.0 / jnp.sqrt(jnp.asarray(fan_in, dtype))
        w = jax.random.uniform(kw, (fan_in, fan_out), dtype, -scale, scale)
        b = jax.random.uniform(kb, (1, fan_out), dtype, -scale, scale)
        params.append((w, b))
    return params


def _pick_block_b(batch, requested):
    """Largest divisor of `batch` that is <= requested and a multiple of 8 (or batch)."""
    bm = min(requested, batch)
    for cand in range(bm, 0, -1):
        if batch % cand == 0 and (cand % 8 == 0 or cand == batch):
            return cand
    return batch


def fc_classifier_forward(x, params, *, block_b=256,
                          weight_dtype=jnp.bfloat16, vmem_limit_mb=48):
    """Pallas forward pass. Returns (squeeze(sigmoid_out), encoded) like PyTorch."""
    B, nz = x.shape
    H1 = params[0][0].shape[1]
    H2 = params[5][0].shape[1]
    n_out = params[6][0].shape[1]

    bm = _pick_block_b(B, block_b)
    assert B % bm == 0

    # ---- wrapper-side packing (would be pre-computed once in a real deployment) ----
    # Pad first-layer K (nz) to a multiple of 128 for aligned loads.
    w1, b1 = params[0]
    K1 = _round_up(nz, 128)
    if K1 != nz:
        x_p = jnp.pad(x, ((0, 0), (0, K1 - nz)))
        w1 = jnp.pad(w1, ((0, K1 - nz), (0, 0)))
    else:
        x_p = x

    # Fused, lane-dense tail weight: cols [0,H2) = w6, cols [H2,H2+n_out) = w6 @ wr.
    w6, b6 = params[5]
    wr, br = params[6]
    P = _round_up(H2 + n_out, 128)
    w_fuse = jnp.dot(w6, wr)                 # (H1, n_out), fused in f32
    b_fuse = jnp.dot(b6, wr) + br            # (1, n_out)
    w_tail = jnp.zeros((H1, P), jnp.float32)
    w_tail = w_tail.at[:, :H2].set(w6).at[:, H2:H2 + n_out].set(w_fuse)
    b_tail = jnp.zeros((1, P), jnp.float32)
    b_tail = b_tail.at[:, :H2].set(b6).at[:, H2:H2 + n_out].set(b_fuse)

    # Weights in bf16 (MXU inputs), biases stay f32 (added after f32 accumulation).
    wdt = weight_dtype
    flat = [w1.astype(wdt), b1]
    for (w, b) in params[1:5]:
        flat += [w.astype(wdt), b]
    flat += [w_tail.astype(wdt), b_tail]

    # ---- specs ----
    x_spec = pl.BlockSpec((bm, K1), lambda i: (i, 0))
    rep2d = lambda i: (0, 0)                     # grid-invariant parameter blocks
    param_specs = [pl.BlockSpec(t.shape, rep2d) for t in flat]
    out_spec = pl.BlockSpec((bm, P), lambda i: (i, 0))

    flops = 2 * B * (K1 * H1 + 4 * H1 * H1 + H1 * P)
    bytes_accessed = (x_p.size * x_p.dtype.itemsize
                      + sum(t.size * t.dtype.itemsize for t in flat)
                      + B * P * 4)
    cost = pl.CostEstimate(flops=flops, transcendentals=2 * B * P,
                           bytes_accessed=bytes_accessed)

    kernel = functools.partial(_fc_classifier_kernel, n_hidden2=H2, n_out=n_out)

    packed = pl.pallas_call(
        kernel,
        grid=(B // bm,),
        in_specs=[x_spec] + param_specs,
        out_specs=out_spec,
        out_shape=jax.ShapeDtypeStruct((B, P), jnp.float32),
        compiler_params=pltpu.CompilerParams(
            dimension_semantics=("parallel",),
            vmem_limit_bytes=vmem_limit_mb * 1024 * 1024),
        cost_estimate=cost,
    )(x_p, *flat)

    packed = packed.astype(x.dtype)
    encoded = packed[:, :H2]
    out = packed[:, H2:H2 + n_out]
    # torch.squeeze(out): (B, 1) -> (B,)   (glue, not hot path)
    return jnp.squeeze(out), encoded


def _reference_forward(x, params, weight_dtype):
    """Pure-JAX reference mirroring the kernel's bf16-weight / f32-accum numerics."""
    h = x.astype(jnp.float32)
    for (w, b) in params[:5]:
        h = jnp.dot(h.astype(weight_dtype), w.astype(weight_dtype),
                    preferred_element_type=jnp.float32) + b
        h = jnp.maximum(h, 0.0)
    w6, b6 = params[5]
    wr, br = params[6]
    enc = jnp.dot(h.astype(weight_dtype), w6.astype(weight_dtype),
                  preferred_element_type=jnp.float32) + b6
    logits = jnp.dot(enc, wr, preferred_element_type=jnp.float32) + br
    out = jax.nn.sigmoid(logits)
    return jnp.squeeze(out), enc


if __name__ == "__main__":
    # Small shapes consistent with the module (nz latent dim, MLP hidden,
    # 2-d encoded space, 1 sigmoid output).  B=16 with block_b=8 exercises the
    # batch-tiled grid (2 steps) and the lane-dense packed output path.
    B, NZ, NH1, NH2, NOUT = 16, 32, 128, 2, 1

    key = jax.random.PRNGKey(0)
    key, kx = jax.random.split(key)
    x = jax.random.normal(kx, (B, NZ), jnp.float32)

    params = init_params(key, NZ, n_hidden1=NH1, n_hidden2=NH2, n_out=NOUT)

    out, encoded = fc_classifier_forward(x, params, block_b=8)
    jax.block_until_ready((out, encoded))

    out_ref, enc_ref = _reference_forward(x, params, jnp.bfloat16)

    assert out.shape == (B,), out.shape
    assert encoded.shape == (B, NH2), encoded.shape
    # approx-reciprocal sigmoid may over/undershoot [0,1] by ~1e-3
    assert bool(jnp.all((out > -1e-2) & (out < 1.0 + 1e-2)))
    assert bool(jnp.allclose(encoded, enc_ref, atol=2e-2, rtol=2e-2)), \
        float(jnp.max(jnp.abs(encoded - enc_ref)))
    assert bool(jnp.allclose(out, out_ref, atol=2e-2, rtol=2e-2)), \
        float(jnp.max(jnp.abs(out - out_ref)))

    print("KERNEL_OK")
</pallas_src>

<mosaic_0001>
module attributes {stable_mosaic.version = 11 : i64} {
  func.func @_fc_classifier_kernel(%arg0: i32, %arg1: memref<8x128xf32, #tpu.memory_space<vmem>>, %arg2: memref<128x128xbf16, #tpu.memory_space<vmem>>, %arg3: memref<1x128xf32, #tpu.memory_space<vmem>>, %arg4: memref<128x128xbf16, #tpu.memory_space<vmem>>, %arg5: memref<1x128xf32, #tpu.memory_space<vmem>>, %arg6: memref<128x128xbf16, #tpu.memory_space<vmem>>, %arg7: memref<1x128xf32, #tpu.memory_space<vmem>>, %arg8: memref<128x128xbf16, #tpu.memory_space<vmem>>, %arg9: memref<1x128xf32, #tpu.memory_space<vmem>>, %arg10: memref<128x128xbf16, #tpu.memory_space<vmem>>, %arg11: memref<1x128xf32, #tpu.memory_space<vmem>>, %arg12: memref<128x128xbf16, #tpu.memory_space<vmem>>, %arg13: memref<1x128xf32, #tpu.memory_space<vmem>>, %arg14: memref<8x128xf32, #tpu.memory_space<vmem>>) attributes {dimension_semantics = [#tpu.dimension_semantics<parallel>], iteration_bounds = array<i64: 2>, scalar_prefetch = 0 : i64, scratch_operands = 0 : i64, tpu.core_type = #tpu.core_type<tc>, window_params = [{transform_indices = @transform_0, window_bounds = array<i64: 8, 128>}, {pipeline_mode = #tpu.pipeline_mode<synchronous>, transform_indices = @transform_1, window_bounds = array<i64: 128, 128>}, {pipeline_mode = #tpu.pipeline_mode<synchronous>, transform_indices = @transform_2, window_bounds = array<i64: 1, 128>}, {pipeline_mode = #tpu.pipeline_mode<synchronous>, transform_indices = @transform_3, window_bounds = array<i64: 128, 128>}, {pipeline_mode = #tpu.pipeline_mode<synchronous>, transform_indices = @transform_4, window_bounds = array<i64: 1, 128>}, {pipeline_mode = #tpu.pipeline_mode<synchronous>, transform_indices = @transform_5, window_bounds = array<i64: 128, 128>}, {pipeline_mode = #tpu.pipeline_mode<synchronous>, transform_indices = @transform_6, window_bounds = array<i64: 1, 128>}, {pipeline_mode = #tpu.pipeline_mode<synchronous>, transform_indices = @transform_7, window_bounds = array<i64: 128, 128>}, {pipeline_mode = #tpu.pipeline_mode<synchronous>, transform_indices = @transform_8, window_bounds = array<i64: 1, 128>}, {pipeline_mode = #tpu.pipeline_mode<synchronous>, transform_indices = @transform_9, window_bounds = array<i64: 128, 128>}, {pipeline_mode = #tpu.pipeline_mode<synchronous>, transform_indices = @transform_10, window_bounds = array<i64: 1, 128>}, {pipeline_mode = #tpu.pipeline_mode<synchronous>, transform_indices = @transform_11, window_bounds = array<i64: 128, 128>}, {pipeline_mode = #tpu.pipeline_mode<synchronous>, transform_indices = @transform_12, window_bounds = array<i64: 1, 128>}, {transform_indices = @transform_13, window_bounds = array<i64: 8, 128>}]} {
    %c0 = arith.constant 0 : index
    %c0_0 = arith.constant 0 : index
    %0 = vector.load %arg1[%c0, %c0_0] : memref<8x128xf32, #tpu.memory_space<vmem>>, vector<8x128xf32>
    %1 = arith.truncf %0 : vector<8x128xf32> to vector<8x128xbf16>
    %c0_1 = arith.constant 0 : index
    %c0_2 = arith.constant 0 : index
    %2 = vector.load %arg2[%c0_1, %c0_2] : memref<128x128xbf16, #tpu.memory_space<vmem>>, vector<128x128xbf16>
    %cst = arith.constant dense<0.000000e+00> : vector<8x128xf32>
    %3 = tpu.matmul %1, %2, %cst {dimension_numbers = #tpu.dot_dimension_numbers<[1], [0], [0], [1], [0, 0, 1, 1], [], []>} : vector<8x128xbf16>, vector<128x128xbf16>, vector<8x128xf32> -> vector<8x128xf32>
    %c0_3 = arith.constant 0 : index
    %c0_4 = arith.constant 0 : index
    %4 = vector.load %arg3[%c0_3, %c0_4] : memref<1x128xf32, #tpu.memory_space<vmem>>, vector<1x128xf32>
    %5 = vector.broadcast %4 : vector<1x128xf32> to vector<8x128xf32>
    %6 = arith.addf %3, %5 : vector<8x128xf32>
    %cst_5 = arith.constant 0.000000e+00 : f32
    %7 = vector.broadcast %cst_5 : f32 to vector<8x128xf32>
    %8 = arith.maximumf %6, %7 : vector<8x128xf32>
    %9 = arith.truncf %8 : vector<8x128xf32> to vector<8x128xbf16>
    %c0_6 = arith.constant 0 : index
    %c0_7 = arith.constant 0 : index
    %10 = vector.load %arg4[%c0_6, %c0_7] : memref<128x128xbf16, #tpu.memory_space<vmem>>, vector<128x128xbf16>
    %cst_8 = arith.constant dense<0.000000e+00> : vector<8x128xf32>
    %11 = tpu.matmul %9, %10, %cst_8 {dimension_numbers = #tpu.dot_dimension_numbers<[1], [0], [0], [1], [0, 0, 1, 1], [], []>} : vector<8x128xbf16>, vector<128x128xbf16>, vector<8x128xf32> -> vector<8x128xf32>
    %c0_9 = arith.constant 0 : index
    %c0_10 = arith.constant 0 : index
    %12 = vector.load %arg5[%c0_9, %c0_10] : memref<1x128xf32, #tpu.memory_space<vmem>>, vector<1x128xf32>
    %13 = vector.broadcast %12 : vector<1x128xf32> to vector<8x128xf32>
    %14 = arith.addf %11, %13 : vector<8x128xf32>
    %cst_11 = arith.constant 0.000000e+00 : f32
    %15 = vector.broadcast %cst_11 : f32 to vector<8x128xf32>
    %16 = arith.maximumf %14, %15 : vector<8x128xf32>
    %17 = arith.truncf %16 : vector<8x128xf32> to vector<8x128xbf16>
    %c0_12 = arith.constant 0 : index
    %c0_13 = arith.constant 0 : index
    %18 = vector.load %arg6[%c0_12, %c0_13] : memref<128x128xbf16, #tpu.memory_space<vmem>>, vector<128x128xbf16>
    %cst_14 = arith.constant dense<0.000000e+00> : vector<8x128xf32>
    %19 = tpu.matmul %17, %18, %cst_14 {dimension_numbers = #tpu.dot_dimension_numbers<[1], [0], [0], [1], [0, 0, 1, 1], [], []>} : vector<8x128xbf16>, vector<128x128xbf16>, vector<8x128xf32> -> vector<8x128xf32>
    %c0_15 = arith.constant 0 : index
    %c0_16 = arith.constant 0 : index
    %20 = vector.load %arg7[%c0_15, %c0_16] : memref<1x128xf32, #tpu.memory_space<vmem>>, vector<1x128xf32>
    %21 = vector.broadcast %20 : vector<1x128xf32> to vector<8x128xf32>
    %22 = arith.addf %19, %21 : vector<8x128xf32>
    %cst_17 = arith.constant 0.000000e+00 : f32
    %23 = vector.broadcast %cst_17 : f32 to vector<8x128xf32>
    %24 = arith.maximumf %22, %23 : vector<8x128xf32>
    %25 = arith.truncf %24 : vector<8x128xf32> to vector<8x128xbf16>
    %c0_18 = arith.constant 0 : index
    %c0_19 = arith.constant 0 : index
    %26 = vector.load %arg8[%c0_18, %c0_19] : memref<128x128xbf16, #tpu.memory_space<vmem>>, vector<128x128xbf16>
    %cst_20 = arith.constant dense<0.000000e+00> : vector<8x128xf32>
    %27 = tpu.matmul %25, %26, %cst_20 {dimension_numbers = #tpu.dot_dimension_numbers<[1], [0], [0], [1], [0, 0, 1, 1], [], []>} : vector<8x128xbf16>, vector<128x128xbf16>, vector<8x128xf32> -> vector<8x128xf32>
    %c0_21 = arith.constant 0 : index
    %c0_22 = arith.constant 0 : index
    %28 = vector.load %arg9[%c0_21, %c0_22] : memref<1x128xf32, #tpu.memory_space<vmem>>, vector<1x128xf32>
    %29 = vector.broadcast %28 : vector<1x128xf32> to vector<8x128xf32>
    %30 = arith.addf %27, %29 : vector<8x128xf32>
    %cst_23 = arith.constant 0.000000e+00 : f32
    %31 = vector.broadcast %cst_23 : f32 to vector<8x128xf32>
    %32 = arith.maximumf %30, %31 : vector<8x128xf32>
    %33 = arith.truncf %32 : vector<8x128xf32> to vector<8x128xbf16>
    %c0_24 = arith.constant 0 : index
    %c0_25 = arith.constant 0 : index
    %34 = vector.load %arg10[%c0_24, %c0_25] : memref<128x128xbf16, #tpu.memory_space<vmem>>, vector<128x128xbf16>
    %cst_26 = arith.constant dense<0.000000e+00> : vector<8x128xf32>
    %35 = tpu.matmul %33, %34, %cst_26 {dimension_numbers = #tpu.dot_dimension_numbers<[1], [0], [0], [1], [0, 0, 1, 1], [], []>} : vector<8x128xbf16>, vector<128x128xbf16>, vector<8x128xf32> -> vector<8x128xf32>
    %c0_27 = arith.constant 0 : index
    %c0_28 = arith.constant 0 : index
    %36 = vector.load %arg11[%c0_27, %c0_28] : memref<1x128xf32, #tpu.memory_space<vmem>>, vector<1x128xf32>
    %37 = vector.broadcast %36 : vector<1x128xf32> to vector<8x128xf32>
    %38 = arith.addf %35, %37 : vector<8x128xf32>
    %cst_29 = arith.constant 0.000000e+00 : f32
    %39 = vector.broadcast %cst_29 : f32 to vector<8x128xf32>
    %40 = arith.maximumf %38, %39 : vector<8x128xf32>
    %41 = arith.truncf %40 : vector<8x128xf32> to vector<8x128xbf16>
    %c0_30 = arith.constant 0 : index
    %c0_31 = arith.constant 0 : index
    %42 = vector.load %arg12[%c0_30, %c0_31] : memref<128x128xbf16, #tpu.memory_space<vmem>>, vector<128x128xbf16>
    %cst_32 = arith.constant dense<0.000000e+00> : vector<8x128xf32>
    %43 = tpu.matmul %41, %42, %cst_32 {dimension_numbers = #tpu.dot_dimension_numbers<[1], [0], [0], [1], [0, 0, 1, 1], [], []>} : vector<8x128xbf16>, vector<128x128xbf16>, vector<8x128xf32> -> vector<8x128xf32>
    %c0_33 = arith.constant 0 : index
    %c0_34 = arith.constant 0 : index
    %44 = vector.load %arg13[%c0_33, %c0_34] : memref<1x128xf32, #tpu.memory_space<vmem>>, vector<1x128xf32>
    %45 = vector.broadcast %44 : vector<1x128xf32> to vector<8x128xf32>
    %46 = arith.addf %43, %45 : vector<8x128xf32>
    %47 = tpu.iota {dimensions = array<i32: 1>} : vector<8x128xi32>
    %c2_i32 = arith.constant 2 : i32
    %48 = vector.broadcast %c2_i32 : i32 to vector<8x128xi32>
    %49 = arith.cmpi sge, %47, %48 : vector<8x128xi32>
    %c3_i32 = arith.constant 3 : i32
    %50 = vector.broadcast %c3_i32 : i32 to vector<8x128xi32>
    %51 = arith.cmpi slt, %47, %50 : vector<8x128xi32>
    %52 = arith.andi %49, %51 : vector<8x128xi1>
    %cst_35 = arith.constant 0.000000e+00 : f32
    %53 = vector.broadcast %cst_35 : f32 to vector<8x128xf32>
    %54 = arith.subf %53, %46 : vector<8x128xf32>
    %55 = math.exp %54 : vector<8x128xf32>
    %cst_36 = arith.constant 1.000000e+00 : f32
    %56 = vector.broadcast %cst_36 : f32 to vector<8x128xf32>
    %57 = arith.addf %56, %55 : vector<8x128xf32>
    %58 = tpu.reciprocal %57 {approx = true} : vector<8x128xf32> -> vector<8x128xf32>
    %59 = arith.select %52, %58, %46 : vector<8x128xi1>, vector<8x128xf32>
    %c0_37 = arith.constant 0 : index
    %c0_38 = arith.constant 0 : index
    %60 = vector.load %arg14[%c0_37, %c0_38] : memref<8x128xf32, #tpu.memory_space<vmem>>, vector<8x128xf32>
    tpu.vector_store %arg14[%c0_37, %c0_38], %59 {strides = array<i32>} : memref<8x128xf32, #tpu.memory_space<vmem>>, vector<8x128xf32>,
    return
  }
  func.func @transform_0(%arg0: i32) -> (i32, i32) {
    %c0_i32 = arith.constant 0 : i32
    %c0_i32_0 = arith.constant 0 : i32
    return %arg0, %c0_i32 : i32, i32
  }
  func.func @transform_1(%arg0: i32) -> (i32, i32) {
    %c0_i32 = arith.constant 0 : i32
    %c0_i32_0 = arith.constant 0 : i32
    %c0_i32_1 = arith.constant 0 : i32
    return %c0_i32, %c0_i32_0 : i32, i32
  }
  func.func @transform_2(%arg0: i32) -> (i32, i32) {
    %c0_i32 = arith.constant 0 : i32
    %c0_i32_0 = arith.constant 0 : i32
    %c0_i32_1 = arith.constant 0 : i32
    return %c0_i32, %c0_i32_0 : i32, i32
  }
  func.func @transform_3(%arg0: i32) -> (i32, i32) {
    %c0_i32 = arith.constant 0 : i32
    %c0_i32_0 = arith.constant 0 : i32
    %c0_i32_1 = arith.constant 0 : i32
    return %c0_i32, %c0_i32_0 : i32, i32
  }
  func.func @transform_4(%arg0: i32) -> (i32, i32) {
    %c0_i32 = arith.constant 0 : i32
    %c0_i32_0 = arith.constant 0 : i32
    %c0_i32_1 = arith.constant 0 : i32
    return %c0_i32, %c0_i32_0 : i32, i32
  }
  func.func @transform_5(%arg0: i32) -> (i32, i32) {
    %c0_i32 = arith.constant 0 : i32
    %c0_i32_0 = arith.constant 0 : i32
    %c0_i32_1 = arith.constant 0 : i32
    return %c0_i32, %c0_i32_0 : i32, i32
  }
  func.func @transform_6(%arg0: i32) -> (i32, i32) {
    %c0_i32 = arith.constant 0 : i32
    %c0_i32_0 = arith.constant 0 : i32
    %c0_i32_1 = arith.constant 0 : i32
    return %c0_i32, %c0_i32_0 : i32, i32
  }
  func.func @transform_7(%arg0: i32) -> (i32, i32) {
    %c0_i32 = arith.constant 0 : i32
    %c0_i32_0 = arith.constant 0 : i32
    %c0_i32_1 = arith.constant 0 : i32
    return %c0_i32, %c0_i32_0 : i32, i32
  }
  func.func @transform_8(%arg0: i32) -> (i32, i32) {
    %c0_i32 = arith.constant 0 : i32
    %c0_i32_0 = arith.constant 0 : i32
    %c0_i32_1 = arith.constant 0 : i32
    return %c0_i32, %c0_i32_0 : i32, i32
  }
  func.func @transform_9(%arg0: i32) -> (i32, i32) {
    %c0_i32 = arith.constant 0 : i32
    %c0_i32_0 = arith.constant 0 : i32
    %c0_i32_1 = arith.constant 0 : i32
    return %c0_i32, %c0_i32_0 : i32, i32
  }
  func.func @transform_10(%arg0: i32) -> (i32, i32) {
    %c0_i32 = arith.constant 0 : i32
    %c0_i32_0 = arith.constant 0 : i32
    %c0_i32_1 = arith.constant 0 : i32
    return %c0_i32, %c0_i32_0 : i32, i32
  }
  func.func @transform_11(%arg0: i32) -> (i32, i32) {
    %c0_i32 = arith.constant 0 : i32
    %c0_i32_0 = arith.constant 0 : i32
    %c0_i32_1 = arith.constant 0 : i32
    return %c0_i32, %c0_i32_0 : i32, i32
  }
  func.func @transform_12(%arg0: i32) -> (i32, i32) {
    %c0_i32 = arith.constant 0 : i32
    %c0_i32_0 = arith.constant 0 : i32
    %c0_i32_1 = arith.constant 0 : i32
    return %c0_i32, %c0_i32_0 : i32, i32
  }
  func.func @transform_13(%arg0: i32) -> (i32, i32) {
    %c0_i32 = arith.constant 0 : i32
    %c0_i32_0 = arith.constant 0 : i32
    return %arg0, %c0_i32 : i32, i32
  }
}

</mosaic_0001>

<bundles_post_ra>
// kernel: tpu_custom_call.1
= control target key start
LH: loop header
LB: loop body
LE: loop exit
PB: predicated region body
PF: predicated region fallthrough
CT: control target
= control target key end

     0   :  { %s2185_s0 = inlined_call_operand.hbm [shape: f32[16,128], index: 0, kind: input, shape index: {}]   ;;  %s2186_s1 = inlined_call_operand.hbm [shape: bf16[128,128], index: 1, kind: input, shape index: {}]   ;;  %s2187_s2 = inlined_call_operand.vmem [shape: f32[1,128], index: 2, kind: input, shape index: {}]   ;;  %s2188_s3 = inlined_call_operand.hbm [shape: bf16[128,128], index: 3, kind: input, shape index: {}]   ;;  %s2189_s4 = inlined_call_operand.vmem [shape: f32[1,128], index: 4, kind: input, shape index: {}]   ;;  %s2190_s5 = inlined_call_operand.hbm [shape: bf16[128,128], index: 5, kind: input, shape index: {}]   ;;  %s2191_s6 = inlined_call_operand.vmem [shape: f32[1,128], index: 6, kind: input, shape index: {}]   ;;  %s2192_s7 = inlined_call_operand.hbm [shape: bf16[128,128], index: 7, kind: input, shape index: {}]   ;;  %s2193_s8 = inlined_call_operand.vmem [shape: f32[1,128], index: 8, kind: input, shape index: {}]   ;;  %s2194_s9 = inlined_call_operand.hbm [shape: bf16[128,128], index: 9, kind: input, shape index: {}]   ;;  %s2195_s10 = inlined_call_operand.vmem [shape: f32[1,128], index: 10, kind: input, shape index: {}]   ;;  %s2196_s11 = inlined_call_operand.hbm [shape: bf16[128,128], index: 11, kind: input, shape index: {}]   ;;  %s2197_s12 = inlined_call_operand.vmem [shape: f32[1,128], index: 12, kind: input, shape index: {}]   ;;  %s2198_s13 = inlined_call_operand.hbm [shape: f32[16,128], index: 13, kind: output, shape index: {}]  }
   0x1   :  { %2200 = sst [smem:[#allocation21_spill]] %s2186_s1 }
   0x2   :  { %2201 = sst [smem:[#allocation22_spill]] %s2188_s3 }
   0x3   :  { %2202 = sst [smem:[#allocation23_spill]] %s2190_s5 }
   0x4   :  { %2203 = sst [smem:[#allocation24_spill]] %s2192_s7 }
   0x5   :  { %2204 = sst [smem:[#allocation25_spill]] %s2194_s9 }
   0x6   :  { %2205 = sst [smem:[#allocation26_spill]] %s2196_s11 }
   0x7   :  { %2206 = sst [smem:[#allocation27_spill]] %s2198_s13 }
   0x8   :  { %18 = vsyncpa [#allocation3], 0 }
   0x9   :  { %20 = vsyncpa [#allocation3 + $0x1], 0 }
   0xa   :  { %21 = vsyncpa [#allocation6], 0 }
   0xb   :  { %22 = vsyncpa [#allocation9], 0 }
   0xc   :  { %23 = vsyncpa [#allocation12], 0 }
   0xd   :  { %24 = vsyncpa [#allocation4], 0 }
   0xe   :  { %26 = vsyncpa [#allocation4 + $0x1], 0  ;;  %s1961_s25 = smov 0   ;;  %s1963_s26 = smov 0  }
   0xf   :  { %s1965_s27 = smov 0   ;;  %s1967_s28 = smov 0  }
  0x10 LB: > { %s2207_s1 = sld [smem:[#allocation21_spill]]  ;;  %s1985_s15 = sadd.s32 4294967295, %s1881_s28   ;;  %s1881_s28 = sphi %s1967_s28, %s2227_s28   ;;  %s1877_s27 = sphi %s1965_s27, %s2226_s27   ;;  %s1873_s26 = sphi %s1963_s26, %s2225_s26   ;;  %s1869_s25 = sphi %s1961_s25, %s2224_s25  }
  0x11   : > { %p1211_p0 = scmp.ge.s32.totalorder %s1881_s28, 1  ;;  %p53_p1 = scmp.eq.s32.totalorder %s1985_s15, 0 }
  0x12   : > { %p341_p2 = scmp.lt.s32.totalorder %s1881_s28, 3  ;;  %s1883_s17 = smov [#allocation5]  }
  0x13   : > { %s354_s18 = sshll.u32 %s1883_s17, 4  ;;  %s2209_s5 = sld [smem:[#allocation23_spill]]  ;;  %s355_s18 = int_to_ptr.vmem [resolvable:$true] %s354_s18 }
  0x14   : > { %p1990_p3 = pnand %p1211_p0, %p341_p2  ;;  %s2211_s9 = sld [smem:[#allocation25_spill]] }
  0x15   : > { %s1884_s30 = smov [#allocation8]   ;;  %s1886_s13 = smov 4  }
  0x16   : > { %s352_s14 = sshll.u32 %s2207_s1, 4  ;;  %p1502_p4 = pneg %p1990_p3  ;;  %s353_s14 = int_to_ptr.hbm [resolvable:$true] %s352_s14 }
  0x17   : > { %s388_s17 = sshll.u32 %s1884_s30, 4  ;;  %s1885_s1 = smov 64   ;;  %s389_s17 = int_to_ptr.vmem [resolvable:$true] %s388_s17 }
  0x18   : > { %p2002_p6 = pnand %p1502_p4, %p53_p1  ;;  %s2212_s3 = sld [smem:[#allocation22_spill]] }
  0x19   : > { %s386_s21 = sshll.u32 %s2209_s5, 4  ;;  %s1887_s24 = smov [#allocation11]   ;;  %s387_s21 = int_to_ptr.hbm [resolvable:$true] %s386_s21 }
  0x1a   : > { %s420_s29 = sshll.u32 %s2211_s9, 4  ;;  %s422_s30 = sshll.u32 %s1887_s24, 4  ;;  %s421_s29 = int_to_ptr.hbm [resolvable:$true] %s420_s29  ;;  %s423_s30 = int_to_ptr.vmem [resolvable:$true] %s422_s30 }
  0x1b   : > { %1505 = dma.hbm_to_vmem [thread:$0]  (!%p2002_p6), %s353_s14, 1024, %s355_s18, [#allocation6], %s1885_s1, %s1885_s1, %s1886_s13  }
  0x1c   : > { %1511 = dma.hbm_to_vmem [thread:$0]  (!%p2002_p6), %s387_s21, 1024, %s389_s17, [#allocation9], %s1885_s1, %s1885_s1, %s1886_s13  }
  0x1d   : > { %1517 = dma.hbm_to_vmem [thread:$0]  (!%p2002_p6), %s421_s29, 1024, %s423_s30, [#allocation12], %s1885_s1, %s1885_s1, %s1886_s13  }
  0x1e   : > { %s369_s23 = sshll.u32 %s2212_s3, 4  ;;  %s1888_s14 = smov [#allocation7]   ;;  %s370_s23 = int_to_ptr.hbm [resolvable:$true] %s369_s23 }
  0x1f   : > { %s371_s18 = sshll.u32 %s1888_s14, 4  ;;  %s2213_s7 = sld [smem:[#allocation24_spill]]  ;;  %s372_s18 = int_to_ptr.vmem [resolvable:$true] %s371_s18 }
  0x20   : > { %1508 = dma.hbm_to_vmem [thread:$0]  (!%p2002_p6), %s370_s23, 1024, %s372_s18, [#allocation6], %s1885_s1, %s1885_s1, %s1886_s13  }
  0x21   : > { %s2214_s11 = sld [smem:[#allocation26_spill]]  ;;  %s1889_s24 = smov [#allocation10]  }
  0x22   : > { %s405_s5 = sshll.u32 %s1889_s24, 4  ;;  %s1890_s23 = smov [#allocation13]   ;;  %s406_s5 = int_to_ptr.vmem [resolvable:$true] %s405_s5 }
  0x23   : > { %s439_s30 = sshll.u32 %s1890_s23, 4  ;;  %s1210_s14 = sadd.s32 4294967294, %s1881_s28   ;;  %s440_s30 = int_to_ptr.vmem [resolvable:$true] %s439_s30 }
  0x24   : > { %s2050_s18 = sadd.s32 1, %s1881_s28   ;;  %s39_s19 = sadd.s32 1, %s1877_s27 }
  0x25   : > { %s403_s17 = sshll.u32 %s2213_s7, 4  ;;  %s36_s21 = ssub.s32 %s1881_s28, %s2050_s18  ;;  %s404_s17 = int_to_ptr.hbm [resolvable:$true] %s403_s17 }
  0x26   : > { %1514 = dma.hbm_to_vmem [thread:$0]  (!%p2002_p6), %s404_s17, 1024, %s406_s5, [#allocation9], %s1885_s1, %s1885_s1, %s1886_s13  }
  0x27   : > { %s437_s20 = sshll.u32 %s2214_s11, 4  ;;  %p37_p7 = scmp.eq.s32.totalorder %s36_s21, 0  ;;  %s438_s20 = int_to_ptr.hbm [resolvable:$true] %s437_s20 }
  0x28   : > { %1520 = dma.hbm_to_vmem [thread:$0]  (!%p2002_p6), %s438_s20, 1024, %s440_s30, [#allocation12], %s1885_s1, %s1885_s1, %s1886_s13  }
  0x29   : > { %p46_p8 = scmp.ne.s32.totalorder %s1877_s27, %s1873_s26  ;;  %p47_p9 = scmp.eq.s32.totalorder %s1881_s28, 0 }
  0x2a   : > { %p52_p10 = scmp.ne.s32.totalorder %s1873_s26, %s1869_s25  ;;  %p328_p13 = scmp.eq.s32.totalorder %s1985_s15, 1 }
  0x2b   : > { %s2061_s17 = scalar_select %p37_p7, %s1877_s27, %s39_s19  }
  0x2c   : > { %p2063_p11 = por %p47_p9, %p46_p8  ;;  %p2069_p12 = por %p53_p1, %p52_p10 }
  0x2d   : > { %2215 = sst [smem:[#allocation20_spill]] %s2061_s17  ;;  %p334_p0 = scmp.eq.s32.totalorder %s1210_s14, 1 }
  0x2e   : > { %p1535_p2 = scmp.lt.s32.totalorder %s1881_s28, 2  ;;  %s456_s13 = sand.u32 1, %s1877_s27  }
  0x2f   : > { %p2076_p4 = por %p328_p13, %p46_p8  ;;  %p2080_p6 = por %p334_p0, %p52_p10 }
  0x30   : > { %s1219_s24 = sshll.u32 %s456_s13, 3  ;;  %s1220_s5 = sshll.u32 %s1881_s28, 3 }
  0x31   : > { %s464_s21 = scalar_lea.hbm %s2185_s0, %s1220_s5  ;;  %s460_s19 = scalar_lea.vmem [#allocation2], %s1219_s24 }
  0x32   : > { %s468_s3 = sshll.u32 %s460_s19, 4  ;;  %s466_s7 = sshll.u32 %s464_s21, 4  ;;  %s469_s3 = int_to_ptr.vmem [resolvable:$true] %s468_s3  ;;  %s467_s7 = int_to_ptr.hbm [resolvable:$true] %s466_s7 }
  0x33   : > { %p2090_p7 = pnand %p1535_p2, %p2063_p11  ;;  %s457_s9 = scalar_lea.sflag [#allocation3], %s456_s13 }
  0x34   : > { %s1773_s11 = sshra.s32 %s467_s7, 4  ;;  %s1780_s23 = scalar_lea.hbm %s2185_s0, 16  ;;  %s1774_s11 = int_to_ptr.hbm [resolvable:$true] %s1773_s11 }
  0x35   : > { %s1775_s17 = scalar_lea.hbm %s1774_s11, 8  ;;  %p1777_p9 = pneg %p2090_p7 }
  0x36   : > { %p1776_p8 = scmp.ne.s32.totalorder %s1774_s11, %s1775_s17  ;;  %p1781_p11 = scmp.lt.s32.totalorder %s1774_s11, %s2185_s0 }
  0x37   : > { %p1782_p0 = scmp.lt.s32.totalorder %s1780_s23, %s1775_s17 }
  0x38   : > { %p1778_p10 = pnand %p1777_p9, %p1776_p8 }
  0x39   : > { %p1783_p2 = por %p1782_p0, %p1781_p11 }
  0x3a   : > { %p1779_p13 = pneg %p1778_p10 }
  0x3c   : > { %p1784_p5 = pnand %p1783_p2, %p1779_p13 }
  0x3e   : > { %1787 = shalt.err (!%p1784_p5)
}
  0x3f   : > { %1524 = dma.hbm_to_vmem [thread:$0]  (!%p2090_p7), %s467_s7, 128, %s469_s3, %s457_s9  }
  0x40   : > { %477 = sbr.rel (%p1990_p3) target bundleno = 932 (0x3a4), region = 72  ;;  %s2107_s13 = sand.u32 (!%p1990_p3), 1, %s1873_s26  }
  0x41   : > { %s1222_s21 = sshll.u32 (!%p1990_p3), %s2107_s13, 3  ;;  %s480_s19 = scalar_lea.sflag (!%p1990_p3), [#allocation3], %s2107_s13 }
  0x42   : > { %s2113_s11 = scalar_lea.vmem (!%p1990_p3), [#allocation2], %s1222_s21 }
  0x45   : > { %1848 = dma.done.wait (%p2069_p12), %s480_s19, 128  }
  0x46   : > { %1850 = vsyncadd (%p2069_p12), %s480_s19, 4294967168 }
  0x47   : > { %1852 = dma.done.wait (%p53_p1), [#allocation6], 2048  }
  0x48   : > { %1854 = vsyncadd (%p53_p1), [#allocation6], 4294965248 }
  0x49   : > { %1856 = dma.done.wait (%p53_p1), [#allocation9], 2048  }
  0x4a   : > { %1858 = vsyncadd (%p53_p1), [#allocation9], 4294965248 }
  0x4b   : > { %1860 = dma.done.wait (%p53_p1), [#allocation12], 2048  }
  0x4c   : > { %1862 = vsyncadd (%p53_p1), [#allocation12], 4294965248  ;;  %v1433_v0 = vld [vmem:[#allocation5 + $0x38] sm:$0xff]  ;;  %v1432_v1 = vld [vmem:[#allocation5 + $0x30] sm:$0xff]  ;;  %s1423_s19 = sshll.u32 %s1985_s15, 3  ;;  %s2221_s7 = sld [smem:[#allocation27_spill]] }
  0x4d   : > { %627 = vmatpush.bf16.msra.mxu0 %v1433_v0  ;;  %v1441_v2 = vld [vmem:[#allocation7 + $0x38] sm:$0xff]  ;;  %v1431_v3 = vld [vmem:[#allocation5 + $0x28] sm:$0xff]  ;;  %v1440_v4 = vld [vmem:[#allocation7 + $0x30] sm:$0xff]  ;;  %s556_s16 = scalar_lea.vmem [#allocation14], %s1222_s21  ;;  %s1068_s15 = scalar_lea.sflag [#allocation4], %s2107_s13 }
  0x4e   : > { %710 = vmatpush.bf16.msra.mxu1 %v1441_v2  ;;  %v1439_v5 = vld [vmem:[#allocation7 + $0x28] sm:$0xff]  ;;  %v1430_v6 = vld [vmem:[#allocation5 + $0x20] sm:$0xff]  ;;  %v1429_v8 = vld [vmem:[#allocation5 + $0x18] sm:$0xff]  ;;  %s1080_s17 = sshll.u32 %s556_s16, 4  ;;  %s1081_s17 = int_to_ptr.vmem [resolvable:$true] %s1080_s17 }
  0x4f   : > { %v1438_v7 = vld [vmem:[#allocation7 + $0x20] sm:$0xff]  ;;  %v1437_v9 = vld [vmem:[#allocation7 + $0x18] sm:$0xff]  ;;  %v1428_v10 = vld [vmem:[#allocation5 + $0x10] sm:$0xff] }
  0x50   : > { %v1436_v11 = vld [vmem:[#allocation7 + $0x10] sm:$0xff]  ;;  %v1427_v12 = vld [vmem:[#allocation5 + $0x8] sm:$0xff]  ;;  %v1426_v13 = vld [vmem:[#allocation5] sm:$0xff] }
  0x51   : > { %628 = vmatpush.bf16.msra.mxu0 %v1432_v1  ;;  %v557_v14 = vld [vmem:[%s2113_s11] sm:$0xff]  ;;  %v1435_v16 = vld [vmem:[#allocation7 + $0x8] sm:$0xff]  ;;  %v1434_v17 = vld [vmem:[#allocation7] sm:$0xff] }
  0x52   : > { %711 = vmatpush.bf16.msra.mxu1 %v1440_v4  ;;  %v558_v15 = vpack.c.bf16 %v557_v14, %v557_v14  ;;  %v1449_v18 = vld [vmem:[#allocation8 + $0x38] sm:$0xff]  ;;  %v1448_v19 = vld [vmem:[#allocation8 + $0x30] sm:$0xff]  ;;  %v1447_v20 = vld [vmem:[#allocation8 + $0x28] sm:$0xff]  ;;  %s1078_s9 = scalar_lea.hbm %s2221_s7, %s1423_s19  ;;  %s1823_s21 = scalar_lea.hbm %s2221_s7, 16 }
  0x53   : > { %793 = vmatpush.bf16.msra.mxu2 %v1449_v18  ;;  %v1446_v21 = vld [vmem:[#allocation8 + $0x20] sm:$0xff]  ;;  %v1445_v22 = vld [vmem:[#allocation8 + $0x18] sm:$0xff]  ;;  %v1444_v23 = vld [vmem:[#allocation8 + $0x10] sm:$0xff]  ;;  %s1082_s1 = sshll.u32 %s1078_s9, 4  ;;  %s1083_s1 = int_to_ptr.hbm [resolvable:$true] %s1082_s1 }
  0x54   : > { %v1583_v24 = vld [vmem:[%s2187_s2] ss:$0 sm:$0xff]  ;;  %v1443_v30 = vld [vmem:[#allocation8 + $0x8] sm:$0xff]  ;;  %v1442_v31 = vld [vmem:[#allocation8] sm:$0xff]  ;;  %s1817_s14 = sshra.s32 %s1083_s1, 4  ;;  %s1818_s14 = int_to_ptr.hbm [resolvable:$true] %s1817_s14 }
  0x55   : > { %629 = vmatpush.bf16.msra.mxu0 %v1431_v3  ;;  %v1457_v32 = vld [vmem:[#allocation10 + $0x38] sm:$0xff]  ;;  %v1456_v33 = vld [vmem:[#allocation10 + $0x30] sm:$0xff]  ;;  %v1455_v34 = vld [vmem:[#allocation10 + $0x28] sm:$0xff]  ;;  %s1819_s24 = scalar_lea.hbm %s1818_s14, 8  ;;  %p1824_p12 = scmp.lt.s32.totalorder %s1818_s14, %s2221_s7 }
  0x56   : > { %712 = vmatpush.bf16.msra.mxu1 %v1439_v5  ;;  %876 = vmatpush.bf16.msra.mxu3 %v1457_v32  ;;  %v1454_v35 = vld [vmem:[#allocation10 + $0x20] sm:$0xff]  ;;  %v1453_v36 = vld [vmem:[#allocation10 + $0x18] sm:$0xff]  ;;  %v1452_v37 = vld [vmem:[#allocation10 + $0x10] sm:$0xff]  ;;  %p1820_p1 = scmp.ne.s32.totalorder %s1818_s14, %s1819_s24  ;;  %p1825_p7 = scmp.lt.s32.totalorder %s1823_s21, %s1819_s24 }
  0x57   : > { %794 = vmatpush.bf16.msra.mxu2 %v1448_v19  ;;  %v1584_v38 = vld [vmem:[%s2189_s4] ss:$0 sm:$0xff]  ;;  %v1451_v44 = vld [vmem:[#allocation10 + $0x8] sm:$0xff]  ;;  %v1450_v45 = vld [vmem:[#allocation10] sm:$0xff] }
  0x58   : > { %v1465_v46 = vld [vmem:[#allocation11 + $0x38] sm:$0xff]  ;;  %v1464_v47 = vld [vmem:[#allocation11 + $0x30] sm:$0xff]  ;;  %v1463_v48 = vld [vmem:[#allocation11 + $0x28] sm:$0xff]  ;;  %p1821_p3 = pnand %p1820_p1, %p2076_p4  ;;  %p1826_p8 = por %p1825_p7, %p1824_p12 }
  0x59   : > { %630 = vmatpush.bf16.msra.mxu0 %v1430_v6  ;;  %v1462_v49 = vld [vmem:[#allocation11 + $0x20] sm:$0xff]  ;;  %v1461_v50 = vld [vmem:[#allocation11 + $0x18] sm:$0xff]  ;;  %v1460_v51 = vld [vmem:[#allocation11 + $0x10] sm:$0xff] }
  0x5a   : > { %713 = vmatpush.bf16.msra.mxu1 %v1438_v7  ;;  %877 = vmatpush.bf16.msra.mxu3 %v1456_v33  ;;  %v1585_v52 = vld [vmem:[%s2191_s6] ss:$0 sm:$0xff]  ;;  %v1459_v58 = vld [vmem:[#allocation11 + $0x8] sm:$0xff]  ;;  %v1458_v59 = vld [vmem:[#allocation11] sm:$0xff]  ;;  %p1822_p5 = pneg %p1821_p3 }
  0x5b   : > { %795 = vmatpush.bf16.msra.mxu2 %v1447_v20  ;;  %v1473_v60 = vld [vmem:[#allocation13 + $0x38] sm:$0xff]  ;;  %v1472_v61 = vld [vmem:[#allocation13 + $0x30] sm:$0xff]  ;;  %v1471_v62 = vld [vmem:[#allocation13 + $0x28] sm:$0xff] }
  0x5c   : > { %v1470_v63 = vld [vmem:[#allocation13 + $0x20] sm:$0xff]  ;;  %v1469_v0 = vld [vmem:[#allocation13 + $0x18] sm:$0xff]  ;;  %v1468_v1 = vld [vmem:[#allocation13 + $0x10] sm:$0xff]  ;;  %p1827_p9 = pnand %p1826_p8, %p1822_p5 }
  0x5d   : > { %631 = vmatpush.bf16.msra.mxu0 %v1429_v8  ;;  %v1586_v2 = vld [vmem:[%s2193_s8] ss:$0 sm:$0xff]  ;;  %v1467_v8 = vld [vmem:[#allocation13 + $0x8] sm:$0xff] }
  0x5e   : > { %714 = vmatpush.bf16.msra.mxu1 %v1437_v9  ;;  %878 = vmatpush.bf16.msra.mxu3 %v1455_v34  ;;  %v1466_v9 = vld [vmem:[#allocation13] sm:$0xff] }
  0x5f   : > { %796 = vmatpush.bf16.msra.mxu2 %v1446_v21 }
  0x61   : > { %632 = vmatpush.bf16.msra.mxu0 %v1428_v10  ;;  %v1587_v10 = vld [vmem:[%s2195_s10] ss:$0 sm:$0xff] }
  0x62   : > { %715 = vmatpush.bf16.msra.mxu1 %v1436_v11  ;;  %879 = vmatpush.bf16.msra.mxu3 %v1454_v35 }
  0x63   : > { %797 = vmatpush.bf16.msra.mxu2 %v1445_v22  ;;  %v1055_v22 = vlaneseq }
  0x65   : > { %633 = vmatpush.bf16.msra.mxu0 %v1427_v12 }
  0x66   : > { %716 = vmatpush.bf16.msra.mxu1 %v1435_v16  ;;  %880 = vmatpush.bf16.msra.mxu3 %v1453_v36  ;;  %v1588_v16 = vld [vmem:[%s2197_s12] ss:$0 sm:$0xff] }
  0x67   : > { %798 = vmatpush.bf16.msra.mxu2 %v1444_v23 }
  0x69   : > { %634 = vmatpush.bf16.msra.mxu0 %v1426_v13 }
  0x6a   : > { %717 = vmatpush.bf16.msra.mxu1 %v1434_v17  ;;  %881 = vmatpush.bf16.msra.mxu3 %v1452_v37 }
  0x6b   : > { %799 = vmatpush.bf16.msra.mxu2 %v1443_v30 }
  0x6c   : > { %635 = vmatmul.bf16.vlgmr.msra.gmra.mxu0 %v558_v15 }
  0x6d   : > { %959 = vmatpush.bf16.msrb.mxu0 %v1465_v46 }
  0x6e   : > { %882 = vmatpush.bf16.msra.mxu3 %v1451_v44  ;;  %1042 = vmatpush.bf16.msrb.mxu1 %v1473_v60 }
  0x6f   : > { %800 = vmatpush.bf16.msra.mxu2 %v1442_v31 }
  0x71   : > { %960 = vmatpush.bf16.msrb.mxu0 %v1464_v47 }
  0x72   : > { %883 = vmatpush.bf16.msra.mxu3 %v1450_v45  ;;  %1043 = vmatpush.bf16.msrb.mxu1 %v1472_v61 }
  0x75   : > { %961 = vmatpush.bf16.msrb.mxu0 %v1463_v48 }
  0x76   : > { %1044 = vmatpush.bf16.msrb.mxu1 %v1471_v62 }
  0x79   : > { %962 = vmatpush.bf16.msrb.mxu0 %v1462_v49 }
  0x7a   : > { %1045 = vmatpush.bf16.msrb.mxu1 %v1470_v63 }
  0x7d   : > { %963 = vmatpush.bf16.msrb.mxu0 %v1461_v50 }
  0x7e   : > { %1046 = vmatpush.bf16.msrb.mxu1 %v1469_v0 }
  0x81   : > { %964 = vmatpush.bf16.msrb.mxu0 %v1460_v51 }
  0x82   : > { %1047 = vmatpush.bf16.msrb.mxu1 %v1468_v1 }
  0x85   : > { %965 = vmatpush.bf16.msrb.mxu0 %v1459_v58 }
  0x86   : > { %1048 = vmatpush.bf16.msrb.mxu1 %v1467_v8 }
  0x89   : > { %966 = vmatpush.bf16.msrb.mxu0 %v1458_v59 }
  0x8a   : > { %1049 = vmatpush.bf16.msrb.mxu1 %v1466_v9 }
  0xe9   : > { %v636_v25 = vpop.f32.mrf.mxu0 }
  0xea   : > { %v637_v26 = vadd.f32 %v1583_v24, %v636_v25  ;;  %v1056_v24 = vand.u32 127, %v1055_v22 }
  0xec   : > { %v640_v27 = vmax.f32 %v637_v26, 0.0  ;;  %vm1057_vm0 = vcmp.ge.s32.totalorder %v1056_v24, 2  ;;  %vm1058_vm1 = vcmp.lt.s32.totalorder %v1056_v24, 3 }
  0xed   : > { %vm1059_vm2 = vmand %vm1057_vm0, %vm1058_vm1 }
  0xee   : > { %v641_v28 = vpack.c.bf16 %v640_v27, %v640_v27 }
  0xf0   : > { %718 = vmatmul.bf16.vlgmr.msra.gmra.mxu1 %v641_v28 }
  0xf1   : > { %v638_v29 = vpop.f32.mrf.mxu0 }
 0x16d   : > { %v719_v39 = vpop.f32.mrf.mxu1 }
 0x16e   : > { %v720_v40 = vadd.f32 %v1584_v38, %v719_v39 }
 0x170   : > { %v723_v41 = vmax.f32 %v720_v40, 0.0 }
 0x172   : > { %v724_v42 = vpack.c.bf16 %v723_v41, %v723_v41 }
 0x174   : > { %801 = vmatmul.bf16.vlgmr.msra.gmra.mxu2 %v724_v42 }
 0x175   : > { %v721_v43 = vpop.f32.mrf.mxu1 }
 0x1f7   : > { %v802_v53 = vpop.f32.mrf.mxu2 }
 0x1f8   : > { %v803_v54 = vadd.f32 %v1585_v52, %v802_v53 }
 0x1fa   : > { %v806_v55 = vmax.f32 %v803_v54, 0.0 }
 0x1fc   : > { %v807_v56 = vpack.c.bf16 %v806_v55, %v806_v55 }
 0x1fe   : > { %884 = vmatmul.bf16.vlgmr.msra.gmra.mxu3 %v807_v56 }
 0x1ff   : > { %v804_v57 = vpop.f32.mrf.mxu2 }
 0x281   : > { %v885_v3 = vpop.f32.mrf.mxu3 }
 0x282   : > { %v886_v4 = vadd.f32 %v1586_v2, %v885_v3 }
 0x284   : > { %v889_v5 = vmax.f32 %v886_v4, 0.0 }
 0x286   : > { %v890_v6 = vpack.c.bf16 %v889_v5, %v889_v5 }
 0x288   : > { %967 = vmatmul.bf16.vlgmr.msrb.gmra.mxu0 %v890_v6 }
 0x289   : > { %v887_v7 = vpop.f32.mrf.mxu3 }
 0x305   : > { %v968_v11 = vpop.f32.mrf.mxu0 }
 0x306   : > { %v969_v12 = vadd.f32 %v1587_v10, %v968_v11 }
 0x308   : > { %v972_v13 = vmax.f32 %v969_v12, 0.0 }
 0x30a   : > { %v973_v14 = vpack.c.bf16 %v972_v13, %v972_v13 }
 0x30c   : > { %1050 = vmatmul.bf16.vlgmr.msrb.gmra.mxu1 %v973_v14 }
 0x30d   : > { %v970_v15 = vpop.f32.mrf.mxu0 }
 0x389   : > { %v1051_v17 = vpop.f32.mrf.mxu1 }
 0x38a   : > { %v1052_v18 = vadd.f32 %v1588_v16, %v1051_v17 }
 0x38c   : > { %v1060_v19 = vsub.f32 0.0, %v1052_v18 }
 0x38e   : > { %v1061_v20 = vmul.f32 1.442695, %v1060_v19 }
 0x390   : > { %1589 = vpow2.f32 %v1061_v20 }
 0x391   : > { %v1053_v21 = vpop.f32.mrf.mxu1 }
 0x396   : > { %v1590_v23 = vpop.eup %1589 }
 0x397   : > { %v1063_v25 = vadd.f32 1.0, %v1590_v23 }
 0x399   : > { %1591 = vrcp.f32 %v1063_v25 }
 0x39f   : > { %v1592_v26 = vpop.eup %1591 }
 0x3a0   : > { %v1065_v27 = vsel %vm1059_vm2, %v1592_v26, %v1052_v18 }
 0x3a1   : > { %1066 = vst [vmem:[%s556_s16] sm:$0xff] %v1065_v27 }
 0x3a2   : > { %1830 = shalt.err (!%p1827_p9)
}
 0x3a3   : > { %1500 = dma.vmem_to_hbm [thread:$0]  (%p2076_p4), %s1081_s17, 128, %s1083_s1, %s1068_s15  }
 0x3a4 PF: > { %s1094_s13 = sand.u32 1, %s1869_s25   ;;  %p2222_p10 = scmp.ge.s32.totalorder %s1881_s28, 2 }
 0x3a5   : > { %s1095_s19 = scalar_lea.sflag [#allocation4], %s1094_s13 }
 0x3a6   : > { %p1526_p13 = pnand %p2222_p10, %p2080_p6 }
 0x3a8   : > { %p1527_p11 = pneg %p1526_p13 }
 0x3aa   : > { %1864 = dma.done.wait (%p1527_p11), %s1095_s19, 128  }
 0x3ab   : > { %1866 = vsyncadd (%p1527_p11), %s1095_s19, 4294967168  ;;  %s2223_s11 = sld [smem:[#allocation20_spill]]  ;;  %p29_p0 = scmp.ge.s32.totalorder %s2050_s18, 4  }
 0x3ac   : > { %s2224_s25 = smov %s1873_s26  ;;  %s2225_s26 = smov %s1877_s27 }
 0x3ad   : > { %s2227_s28 = smov %s2050_s18  ;;  %31 = sbr.rel (!%p29_p0) target bundleno = 16 (0x10), region = 141 }
 0x3b1   : > { %s2226_s27 = smov %s2223_s11 }
 0x3b2   :  { %1101 = vsyncpa [#allocation3], 1 }
 0x3b3   :  { %1103 = vsyncpa [#allocation3 + $0x1], 1 }
 0x3b4   :  { %1104 = vsyncpa [#allocation6], 1 }
 0x3b5   :  { %1105 = vsyncpa [#allocation9], 1 }
 0x3b6   :  { %1106 = vsyncpa [#allocation12], 1 }
 0x3b7   :  { %1107 = vsyncpa [#allocation4], 1 }
 0x3b8   :  { %1109 = vsyncpa [#allocation4 + $0x1], 1 }

</bundles_post_ra>
